<compile_context>
chip_gen: v6e
topology: v6e:2x2x1
jax: 0.10.0
libtpu: 0.0.40
codegen_flags: <defaults>
</compile_context>

<pallas_src>
import functools

import jax
import jax.numpy as jnp
from jax.experimental import pallas as pl
from jax.experimental.pallas import tpu as pltpu


def _round_up(x, m):
    return ((x + m - 1) // m) * m


# ----------------------------------------------------------------------------
# Fused kernel: full Adam optimization loop over var_missing, resident in VMEM.
# ----------------------------------------------------------------------------
def _impute_loop_kernel(c0_ref, smm_ref, g0_ref, mean_ref,          # inputs
                        x_out, loss_out, epoch_out,                 # outputs
                        m_ref, v_ref,                               # scratch (Adam state)
                        *, lr, beta1, beta2, eps, max_epochs, patience, tol,
                        k_epochs, exact):
    # var_missing init = column means of y_obs (broadcast from a single VMEM row; no X0 plane).
    x_out[...] = jnp.broadcast_to(mean_ref[...], x_out.shape)
    m_ref[...] = jnp.zeros_like(m_ref)
    v_ref[...] = jnp.zeros_like(v_ref)
    c0 = c0_ref[0]

    def one_epoch(carry):
        prev_loss, d_loss, pat, b1p, b2p = carry
        x = x_out[...]
        g0 = g0_ref[...]
        if exact:
            sx = jnp.dot(smm_ref[...], x, preferred_element_type=jnp.float32,
                         precision=jax.lax.Precision.HIGHEST)
        else:
            # S_mm lives in VMEM as bf16; x is cast once, right before the MXU.
            sx = jnp.dot(smm_ref[...], x.astype(jnp.bfloat16),
                         preferred_element_type=jnp.float32)
        grad = g0 + sx
        loss = c0 + jnp.sum(x * (g0 + 0.5 * sx))

        # Adam (torch defaults). Bias correction via running beta powers; lr folded into the
        # numerator scale; divide -> EUP approx reciprocal on the fast path.
        b1p = b1p * beta1
        b2p = b2p * beta2
        step = lr * (1.0 / (1.0 - b1p))     # scalar ops only
        rb2 = 1.0 / (1.0 - b2p)
        m = beta1 * m_ref[...] + (1.0 - beta1) * grad
        v = beta2 * v_ref[...] + (1.0 - beta2) * (grad * grad)
        denom = jnp.sqrt(v * rb2) + eps
        if exact:
            x_out[...] = x - (step * m) / denom
        else:
            x_out[...] = x - (step * m) * pl.reciprocal(denom, approx=True)
        m_ref[...] = m
        v_ref[...] = v

        d_loss = prev_loss - loss
        pat = jnp.where(d_loss < 0.0, pat - 1, pat)
        return (loss, d_loss, pat, b1p, b2p)

    def cond(state):
        epoch, _, d_loss, pat, _, _ = state
        return (epoch < max_epochs) & ((d_loss >= tol) | ((d_loss < 0.0) & (pat > 0)))

    def body(state):
        epoch, prev_loss, d_loss, pat, b1p, b2p = state
        carry = (prev_loss, d_loss, pat, b1p, b2p)
        # Amortized convergence check: run k_epochs per while-iteration, unrolled so the LLO
        # scheduler overlaps epoch t+1's matmul with epoch t's Adam update / loss reduce.
        # d_loss / patience are tracked per epoch; only the stopping test is coarsened
        # (may overrun by <= k_epochs-1 epochs; k_epochs=1 restores exact torch semantics).
        carry = jax.lax.fori_loop(0, k_epochs, lambda i, c: one_epoch(c), carry,
                                  unroll=True)
        prev_loss, d_loss, pat, b1p, b2p = carry
        return (epoch + k_epochs, prev_loss, d_loss, pat, b1p, b2p)

    # prev_loss / d_loss init to 1e5 matches the torch module (100000.0).
    init = (jnp.int32(0), jnp.float32(1e5), jnp.float32(1e5),
            jnp.int32(patience), jnp.float32(1.0), jnp.float32(1.0))
    epoch, final_loss, _, _, _, _ = jax.lax.while_loop(cond, body, init)

    loss_out[0] = final_loss
    epoch_out[0] = epoch


# ----------------------------------------------------------------------------
# forward(): mirrors ImputeTorch.forward -> set_params + impute -> var_all
# ----------------------------------------------------------------------------
def impute_forward(y_obs, inv_cov, *, fixed_obs=True, nonneg=False,
                   lambda_spatial_loss=1.0, lr=0.001, max_epochs=1000,
                   patience=10, tol=1e-5,
                   beta1=0.9, beta2=0.999, eps=1e-8,
                   precision=jax.lax.Precision.DEFAULT, check_every=8):
    assert fixed_obs and not nonneg

    y = y_obs.astype(jnp.float32)
    P = inv_cov.astype(jnp.float32)
    n_obs, n_feat = y.shape
    n_all = P.shape[0]
    n_missing = n_all - n_obs

    if n_missing <= 0:
        # Reference warns ("no missing position") and leaves the observation unchanged.
        return y, jnp.float32(0.0), jnp.int32(0)

    max_epochs = 10000 if max_epochs == -1 else max_epochs
    patience = patience if patience > 0 else 1
    exact = (precision == jax.lax.Precision.HIGHEST)

    # Choose epochs-per-convergence-check as the largest divisor of max_epochs <= check_every
    # so the epoch counter never overshoots max_epochs.
    k_epochs = 1
    if check_every > 1 and max_epochs > 0:
        for cand in range(min(check_every, max_epochs), 0, -1):
            if max_epochs % cand == 0:
                k_epochs = cand
                break

    # One-time precompute (exploits that var_obs is fixed):  S = P + P^T.
    hi = jax.lax.Precision.HIGHEST
    S = P + P.T
    S_mm = S[n_obs:, n_obs:]
    S_mo = S[n_obs:, :n_obs]
    P_oo = P[:n_obs, :n_obs]
    G0 = lambda_spatial_loss * jnp.matmul(S_mo, y, precision=hi)               # (n_missing, n_feat)
    c0 = lambda_spatial_loss * jnp.sum(y * jnp.matmul(P_oo, y, precision=hi))  # scalar
    Smm = lambda_spatial_loss * S_mm                                           # (n_missing, n_missing)

    # Padding: rows to 16 (clean bf16 sublane tiles) for small problems, 128/256 for large
    # ones (full MXU tiles on v5e / v6e+); feature axis to 128 lanes (lane-dense stores).
    # Padded rows/cols carry zero gradient and never move.
    if n_missing >= 1024:
        row_mult = 256
    elif n_missing >= 128:
        row_mult = 128
    else:
        row_mult = 16
    nm_pad = _round_up(n_missing, row_mult)
    nf_pad = _round_up(n_feat, 128)

    smm_dtype = jnp.float32 if exact else jnp.bfloat16
    Smm_p = jnp.zeros((nm_pad, nm_pad), smm_dtype).at[:n_missing, :n_missing].set(
        Smm.astype(smm_dtype))
    G0_p = jnp.zeros((nm_pad, nf_pad), jnp.float32).at[:n_missing, :n_feat].set(G0)
    mean_row = jnp.zeros((1, nf_pad), jnp.float32).at[0, :n_feat].set(jnp.mean(y, axis=0))
    c0_arr = c0.reshape(1)

    kernel = functools.partial(
        _impute_loop_kernel, lr=lr, beta1=beta1, beta2=beta2, eps=eps,
        max_epochs=max_epochs, patience=patience, tol=tol,
        k_epochs=k_epochs, exact=exact)

    # VMEM residency: Smm + (G0, x_out, m, v) + mean row. No grid -> single-buffered.
    plane_bytes = nm_pad * nf_pad * 4
    vmem_bytes = Smm_p.size * Smm_p.dtype.itemsize + 4 * plane_bytes + nf_pad * 4
    need = vmem_bytes + (4 << 20)                 # headroom for compiler internal scratch
    compiler_params = None
    if need > (16 << 20):                         # above the smallest (v5e) default scoped limit
        try:
            phys = int(pltpu.get_tpu_info().vmem_capacity_bytes)
        except Exception:
            phys = 64 << 20                       # conservative: v7x per-core VMEM
        cap = max(phys - (8 << 20), 16 << 20)
        # TODO(synk): if need > cap, S_mm must be streamed from HBM in panels (see header).
        compiler_params = pltpu.CompilerParams(vmem_limit_bytes=int(min(need, cap)))

    x_fin, loss_fin, epoch_fin = pl.pallas_call(
        kernel,
        out_shape=(
            jax.ShapeDtypeStruct((nm_pad, nf_pad), jnp.float32),   # var_missing (padded)
            jax.ShapeDtypeStruct((1,), jnp.float32),               # final loss
            jax.ShapeDtypeStruct((1,), jnp.int32),                 # epochs run
        ),
        in_specs=[
            pl.BlockSpec(memory_space=pltpu.MemorySpace.SMEM),     # c0 (scalar)
            pl.BlockSpec(memory_space=pltpu.MemorySpace.VMEM),     # S_mm (lambda-scaled)
            pl.BlockSpec(memory_space=pltpu.MemorySpace.VMEM),     # G0   (lambda-scaled)
            pl.BlockSpec(memory_space=pltpu.MemorySpace.VMEM),     # column-mean row
        ],
        out_specs=(
            pl.BlockSpec(memory_space=pltpu.MemorySpace.VMEM),
            pl.BlockSpec(memory_space=pltpu.MemorySpace.SMEM),
            pl.BlockSpec(memory_space=pltpu.MemorySpace.SMEM),
        ),
        scratch_shapes=[
            pltpu.VMEM((nm_pad, nf_pad), jnp.float32),             # Adam m
            pltpu.VMEM((nm_pad, nf_pad), jnp.float32),             # Adam v
        ],
        compiler_params=compiler_params,
    )(c0_arr, Smm_p, G0_p, mean_row)

    var_missing = x_fin[:n_missing, :n_feat]
    var_all = jnp.concatenate([y, var_missing], axis=0)
    return var_all, loss_fin[0], epoch_fin[0]


# ----------------------------------------------------------------------------
# Pure-JAX reference (full-matrix formulation) for correctness checking only.
# ----------------------------------------------------------------------------
def impute_forward_ref(y_obs, inv_cov, *, lambda_spatial_loss=1.0, lr=0.001,
                       max_epochs=1000, patience=10, tol=1e-5,
                       beta1=0.9, beta2=0.999, eps=1e-8,
                       precision=jax.lax.Precision.HIGHEST):
    y = y_obs.astype(jnp.float32)
    P = inv_cov.astype(jnp.float32)
    n_obs, n_feat = y.shape
    n_missing = P.shape[0] - n_obs
    S = P + P.T

    max_epochs = 10000 if max_epochs == -1 else max_epochs
    patience = patience if patience > 0 else 1

    x0 = jnp.broadcast_to(jnp.mean(y, axis=0, keepdims=True), (n_missing, n_feat))
    m0 = jnp.zeros_like(x0)
    v0 = jnp.zeros_like(x0)

    def cond(st):
        _, _, _, epoch, _, d_loss, pat = st
        return (epoch < max_epochs) & ((d_loss >= tol) | ((d_loss < 0) & (pat > 0)))

    def body(st):
        x, m, v, epoch, prev_loss, _, pat = st
        V = jnp.concatenate([y, x], axis=0)
        loss = lambda_spatial_loss * jnp.sum(V * jnp.matmul(P, V, precision=precision))
        grad = lambda_spatial_loss * jnp.matmul(S, V, precision=precision)[n_obs:, :]
        t = (epoch + 1).astype(jnp.float32)
        bc1 = 1.0 - beta1 ** t
        bc2 = 1.0 - beta2 ** t
        m = beta1 * m + (1.0 - beta1) * grad
        v = beta2 * v + (1.0 - beta2) * grad * grad
        x = x - lr * (m / bc1) / (jnp.sqrt(v / bc2) + eps)
        d_loss = prev_loss - loss
        pat = jnp.where(d_loss < 0, pat - 1, pat)
        return (x, m, v, epoch + 1, loss, d_loss, pat)

    init = (x0, m0, v0, jnp.int32(0), jnp.float32(1e5), jnp.float32(1e5),
            jnp.int32(patience))
    x, _, _, epoch, final_loss, _, _ = jax.lax.while_loop(cond, body, init)
    return jnp.concatenate([y, x], axis=0), final_loss, epoch


if __name__ == "__main__":
    key = jax.random.PRNGKey(0)

    grid_hw = 8
    n_all = grid_hw * grid_hw        # 64 total spots
    n_obs = 48                       # observed spots
    n_missing = n_all - n_obs        # 16 missing spots
    n_feature = 32

    # Observed spatial feature matrix (n_obs x n_feature).
    y_obs = jax.random.normal(key, (n_obs, n_feature), dtype=jnp.float32)

    # spatial_loss_all.inv_cov[0]: ICAR-style precision D - rho*A (+ jitter) on an 8x8 grid.
    ii, jj = jnp.meshgrid(jnp.arange(grid_hw), jnp.arange(grid_hw), indexing="ij")
    coords = jnp.stack([ii.reshape(-1), jj.reshape(-1)], axis=-1).astype(jnp.float32)
    d2 = jnp.sum((coords[:, None, :] - coords[None, :, :]) ** 2, axis=-1)
    A = (d2 == 1.0).astype(jnp.float32)
    D = jnp.diag(jnp.sum(A, axis=1))
    inv_cov = D - 0.9 * A + 0.1 * jnp.eye(n_all, dtype=jnp.float32)

    hi = jax.lax.Precision.HIGHEST

    # --- check 1: block-decomposed loss/grad equals the full formulation (pure JAX) ---
    S = inv_cov + inv_cov.T
    x0 = jnp.broadcast_to(jnp.mean(y_obs, axis=0, keepdims=True), (n_missing, n_feature))
    V0 = jnp.concatenate([y_obs, x0], axis=0)
    qf_full = jnp.sum(V0 * jnp.matmul(inv_cov, V0, precision=hi))
    g_full = jnp.matmul(S, V0, precision=hi)[n_obs:, :]
    G0 = jnp.matmul(S[n_obs:, :n_obs], y_obs, precision=hi)
    c0 = jnp.sum(y_obs * jnp.matmul(inv_cov[:n_obs, :n_obs], y_obs, precision=hi))
    SX = jnp.matmul(S[n_obs:, n_obs:], x0, precision=hi)
    assert jnp.allclose(c0 + jnp.sum(x0 * (G0 + 0.5 * SX)), qf_full, rtol=1e-5, atol=1e-2), \
        "loss decomposition mismatch"
    assert jnp.allclose(G0 + SX, g_full, rtol=1e-4, atol=1e-4), "grad decomposition mismatch"

    # --- check 2: short run, fused Pallas kernel (exact path, per-epoch check) vs reference ---
    run_chk = jax.jit(functools.partial(
        impute_forward, lambda_spatial_loss=1.0, lr=0.01, max_epochs=10,
        patience=10, tol=1e-5, precision=hi, check_every=1))
    ref_chk = jax.jit(functools.partial(
        impute_forward_ref, lambda_spatial_loss=1.0, lr=0.01, max_epochs=10,
        patience=10, tol=1e-5, precision=hi))
    va_k, loss_k, ep_k = run_chk(y_obs, inv_cov)
    va_r, loss_r, ep_r = ref_chk(y_obs, inv_cov)
    jax.block_until_ready(va_k)
    assert int(ep_k) == int(ep_r), f"epoch mismatch: {int(ep_k)} vs {int(ep_r)}"
    assert jnp.allclose(va_k, va_r, rtol=1e-3, atol=1e-3), "var_all mismatch (short run)"
    assert jnp.allclose(loss_k, loss_r, rtol=1e-4, atol=1e-2), "loss mismatch (short run)"

    # --- full forward (whole optimization loop inside one kernel), fast path:
    #     bf16 MXU operands, approx reciprocal, convergence check every 8 epochs ---
    run = jax.jit(functools.partial(
        impute_forward, lambda_spatial_loss=1.0, lr=0.01,
        max_epochs=200, patience=10, tol=1e-5))
    var_all, final_loss, epochs = run(y_obs, inv_cov)
    jax.block_until_ready(var_all)

    assert var_all.shape == (n_all, n_feature)
    assert bool(jnp.all(jnp.isfinite(var_all)))
    assert bool(jnp.isfinite(final_loss))
    assert jnp.allclose(var_all[:n_obs], y_obs), "observed rows must stay fixed"
    print("KERNEL_OK")
</pallas_src>

<mosaic_0001>
module attributes {stable_mosaic.version = 11 : i64} {
  func.func @_impute_loop_kernel(%arg0: memref<1xf32, #tpu.memory_space<smem>>, %arg1: memref<16x16xf32, #tpu.memory_space<vmem>>, %arg2: memref<16x128xf32, #tpu.memory_space<vmem>>, %arg3: memref<1x128xf32, #tpu.memory_space<vmem>>, %arg4: memref<16x128xf32, #tpu.memory_space<vmem>>, %arg5: memref<1xf32, #tpu.memory_space<smem>>, %arg6: memref<1xi32, #tpu.memory_space<smem>>, %arg7: memref<16x128xf32, #tpu.memory_space<vmem>>, %arg8: memref<16x128xf32, #tpu.memory_space<vmem>>) attributes {dimension_semantics = [], scalar_prefetch = 0 : i64, scratch_operands = 2 : i64, tpu.core_type = #tpu.core_type<tc>} {
    %c0 = arith.constant 0 : index
    %c0_0 = arith.constant 0 : index
    %0 = vector.load %arg3[%c0, %c0_0] : memref<1x128xf32, #tpu.memory_space<vmem>>, vector<1x128xf32>
    %1 = vector.shape_cast %0 : vector<1x128xf32> to vector<1x128xf32>
    %2 = vector.broadcast %1 : vector<1x128xf32> to vector<16x128xf32>
    %c0_1 = arith.constant 0 : index
    %c0_2 = arith.constant 0 : index
    %3 = vector.load %arg4[%c0_1, %c0_2] : memref<16x128xf32, #tpu.memory_space<vmem>>, vector<16x128xf32>
    tpu.vector_store %arg4[%c0_1, %c0_2], %2 {strides = array<i32>} : memref<16x128xf32, #tpu.memory_space<vmem>>, vector<16x128xf32>,
    %cst = arith.constant 0.000000e+00 : f32
    %4 = vector.broadcast %cst : f32 to vector<16x128xf32>
    %c0_3 = arith.constant 0 : index
    %c0_4 = arith.constant 0 : index
    %5 = vector.load %arg7[%c0_3, %c0_4] : memref<16x128xf32, #tpu.memory_space<vmem>>, vector<16x128xf32>
    tpu.vector_store %arg7[%c0_3, %c0_4], %4 {strides = array<i32>} : memref<16x128xf32, #tpu.memory_space<vmem>>, vector<16x128xf32>,
    %cst_5 = arith.constant 0.000000e+00 : f32
    %6 = vector.broadcast %cst_5 : f32 to vector<16x128xf32>
    %c0_6 = arith.constant 0 : index
    %c0_7 = arith.constant 0 : index
    %7 = vector.load %arg8[%c0_6, %c0_7] : memref<16x128xf32, #tpu.memory_space<vmem>>, vector<16x128xf32>
    tpu.vector_store %arg8[%c0_6, %c0_7], %6 {strides = array<i32>} : memref<16x128xf32, #tpu.memory_space<vmem>>, vector<16x128xf32>,
    %c0_8 = arith.constant 0 : index
    %8 = memref.load %arg0[%c0_8] : memref<1xf32, #tpu.memory_space<smem>>
    %c0_i32 = arith.constant 0 : i32
    %cst_9 = arith.constant 1.000000e+05 : f32
    %cst_10 = arith.constant 1.000000e+05 : f32
    %c10_i32 = arith.constant 10 : i32
    %cst_11 = arith.constant 1.000000e+00 : f32
    %cst_12 = arith.constant 1.000000e+00 : f32
    %9:6 = scf.while (%arg9 = %c0_i32, %arg10 = %cst_9, %arg11 = %cst_10, %arg12 = %c10_i32, %arg13 = %cst_11, %arg14 = %cst_12) : (i32, f32, f32, i32, f32, f32) -> (i32, f32, f32, i32, f32, f32) {
      %c10_i32_15 = arith.constant 10 : i32
      %12 = arith.cmpi slt, %arg9, %c10_i32_15 : i32
      %cst_16 = arith.constant 9.99999974E-6 : f32
      %13 = arith.cmpf oge, %arg11, %cst_16 : f32
      %cst_17 = arith.constant 0.000000e+00 : f32
      %14 = arith.cmpf olt, %arg11, %cst_17 : f32
      %c0_i32_18 = arith.constant 0 : i32
      %15 = arith.cmpi sgt, %arg12, %c0_i32_18 : i32
      %16 = arith.andi %14, %15 : i1
      %17 = arith.ori %13, %16 : i1
      %18 = arith.andi %12, %17 : i1
      scf.condition(%18) %arg9, %arg10, %arg11, %arg12, %arg13, %arg14 : i32, f32, f32, i32, f32, f32
    } do {
    ^bb0(%arg9: i32, %arg10: f32, %arg11: f32, %arg12: i32, %arg13: f32, %arg14: f32):
      %c0_i32_15 = arith.constant 0 : i32
      %c0_16 = arith.constant 0 : index
      %c0_17 = arith.constant 0 : index
      %12 = vector.load %arg4[%c0_16, %c0_17] : memref<16x128xf32, #tpu.memory_space<vmem>>, vector<16x128xf32>
      %c0_18 = arith.constant 0 : index
      %c0_19 = arith.constant 0 : index
      %13 = vector.load %arg2[%c0_18, %c0_19] : memref<16x128xf32, #tpu.memory_space<vmem>>, vector<16x128xf32>
      %c0_20 = arith.constant 0 : index
      %c0_21 = arith.constant 0 : index
      %14 = vector.load %arg1[%c0_20, %c0_21] : memref<16x16xf32, #tpu.memory_space<vmem>>, vector<16x16xf32>
      %cst_22 = arith.constant dense<0.000000e+00> : vector<16x128xf32>
      %15 = tpu.matmul %14, %12, %cst_22 {dimension_numbers = #tpu.dot_dimension_numbers<[1], [0], [0], [1], [0, 0, 1, 1], [], []>, precision = #tpu.contract_precision<fp32>} : vector<16x16xf32>, vector<16x128xf32>, vector<16x128xf32> -> vector<16x128xf32>
      %16 = arith.addf %13, %15 : vector<16x128xf32>
      %cst_23 = arith.constant 5.000000e-01 : f32
      %17 = vector.broadcast %cst_23 : f32 to vector<16x128xf32>
      %18 = arith.mulf %17, %15 : vector<16x128xf32>
      %19 = arith.addf %13, %18 : vector<16x128xf32>
      %20 = arith.mulf %12, %19 : vector<16x128xf32>
      %21 = vector.shape_cast %20 : vector<16x128xf32> to vector<1x16x128xf32>
      %cst_24 = arith.constant dense<0.000000e+00> : vector<1xf32>
      %22 = vector.multi_reduction <add>, %21, %cst_24 [1, 2] : vector<1x16x128xf32> to vector<1xf32>
      %23 = vector.shape_cast %22 : vector<1xf32> to vector<1x1x1xf32>
      %24 = vector.extract %23[0, 0, 0] : f32 from vector<1x1x1xf32>
      %25 = arith.addf %8, %24 : f32
      %cst_25 = arith.constant 0.899999976 : f32
      %26 = arith.mulf %arg13, %cst_25 : f32
      %cst_26 = arith.constant 9.990000e-01 : f32
      %27 = arith.mulf %arg14, %cst_26 : f32
      %cst_27 = arith.constant 1.000000e+00 : f32
      %28 = arith.subf %cst_27, %26 : f32
      %cst_28 = arith.constant 1.000000e+00 : f32
      %29 = arith.divf %cst_28, %28 : f32
      %cst_29 = arith.constant 0.00999999977 : f32
      %30 = arith.mulf %cst_29, %29 : f32
      %cst_30 = arith.constant 1.000000e+00 : f32
      %31 = arith.subf %cst_30, %27 : f32
      %cst_31 = arith.constant 1.000000e+00 : f32
      %32 = arith.divf %cst_31, %31 : f32
      %c0_32 = arith.constant 0 : index
      %c0_33 = arith.constant 0 : index
      %33 = vector.load %arg7[%c0_32, %c0_33] : memref<16x128xf32, #tpu.memory_space<vmem>>, vector<16x128xf32>
      %cst_34 = arith.constant 0.899999976 : f32
      %34 = vector.broadcast %cst_34 : f32 to vector<16x128xf32>
      %35 = arith.mulf %34, %33 : vector<16x128xf32>
      %cst_35 = arith.constant 1.000000e-01 : f32
      %36 = vector.broadcast %cst_35 : f32 to vector<16x128xf32>
      %37 = arith.mulf %36, %16 : vector<16x128xf32>
      %38 = arith.addf %35, %37 : vector<16x128xf32>
      %c0_36 = arith.constant 0 : index
      %c0_37 = arith.constant 0 : index
      %39 = vector.load %arg8[%c0_36, %c0_37] : memref<16x128xf32, #tpu.memory_space<vmem>>, vector<16x128xf32>
      %cst_38 = arith.constant 9.990000e-01 : f32
      %40 = vector.broadcast %cst_38 : f32 to vector<16x128xf32>
      %41 = arith.mulf %40, %39 : vector<16x128xf32>
      %42 = arith.mulf %16, %16 : vector<16x128xf32>
      %cst_39 = arith.constant 1.000000e-03 : f32
      %43 = vector.broadcast %cst_39 : f32 to vector<16x128xf32>
      %44 = arith.mulf %43, %42 : vector<16x128xf32>
      %45 = arith.addf %41, %44 : vector<16x128xf32>
      %46 = vector.broadcast %32 : f32 to vector<16x128xf32>
      %47 = arith.mulf %45, %46 : vector<16x128xf32>
      %48 = math.sqrt %47 : vector<16x128xf32>
      %cst_40 = arith.constant 9.99999993E-9 : f32
      %49 = vector.broadcast %cst_40 : f32 to vector<16x128xf32>
      %50 = arith.addf %48, %49 : vector<16x128xf32>
      %51 = vector.broadcast %30 : f32 to vector<16x128xf32>
      %52 = arith.mulf %51, %38 : vector<16x128xf32>
      %53 = arith.divf %52, %50 : vector<16x128xf32>
      %54 = arith.subf %12, %53 : vector<16x128xf32>
      %c0_41 = arith.constant 0 : index
      %c0_42 = arith.constant 0 : index
      %55 = vector.load %arg4[%c0_41, %c0_42] : memref<16x128xf32, #tpu.memory_space<vmem>>, vector<16x128xf32>
      tpu.vector_store %arg4[%c0_41, %c0_42], %54 {strides = array<i32>} : memref<16x128xf32, #tpu.memory_space<vmem>>, vector<16x128xf32>,
      %c0_43 = arith.constant 0 : index
      %c0_44 = arith.constant 0 : index
      %56 = vector.load %arg7[%c0_43, %c0_44] : memref<16x128xf32, #tpu.memory_space<vmem>>, vector<16x128xf32>
      tpu.vector_store %arg7[%c0_43, %c0_44], %38 {strides = array<i32>} : memref<16x128xf32, #tpu.memory_space<vmem>>, vector<16x128xf32>,
      %c0_45 = arith.constant 0 : index
      %c0_46 = arith.constant 0 : index
      %57 = vector.load %arg8[%c0_45, %c0_46] : memref<16x128xf32, #tpu.memory_space<vmem>>, vector<16x128xf32>
      tpu.vector_store %arg8[%c0_45, %c0_46], %45 {strides = array<i32>} : memref<16x128xf32, #tpu.memory_space<vmem>>, vector<16x128xf32>,
      %58 = arith.subf %arg10, %25 : f32
      %cst_47 = arith.constant 0.000000e+00 : f32
      %59 = arith.cmpf olt, %58, %cst_47 : f32
      %c1_i32 = arith.constant 1 : i32
      %60 = arith.subi %arg12, %c1_i32 : i32
      %61 = arith.select %59, %60, %arg12 : i32
      %c1_i32_48 = arith.constant 1 : i32
      %c1_i32_49 = arith.constant 1 : i32
      %62 = arith.addi %arg9, %c1_i32_49 : i32
      scf.yield %62, %25, %58, %61, %26, %27 : i32, f32, f32, i32, f32, f32
    }
    %c0_13 = arith.constant 0 : index
    %10 = memref.load %arg5[%c0_13] : memref<1xf32, #tpu.memory_space<smem>>
    memref.store %9#1, %arg5[%c0_13] : memref<1xf32, #tpu.memory_space<smem>>
    %c0_14 = arith.constant 0 : index
    %11 = memref.load %arg6[%c0_14] : memref<1xi32, #tpu.memory_space<smem>>
    memref.store %9#0, %arg6[%c0_14] : memref<1xi32, #tpu.memory_space<smem>>
    return
  }
}

</mosaic_0001>

<bundles_post_ra>
// kernel: impute_forward.1
= control target key start
LH: loop header
LB: loop body
LE: loop exit
PB: predicated region body
PF: predicated region fallthrough
CT: control target
= control target key end

     0   :  { %13 = vsyncpa [#allocation6], 0  ;;  %s1078_s0 = inlined_call_operand.<no memory space> [shape: f32[1], index: 0, kind: input, shape index: {}]   ;;  %s1079_s1 = inlined_call_operand.vmem [shape: f32[16,16], index: 1, kind: input, shape index: {}]   ;;  %s1080_s2 = inlined_call_operand.vmem [shape: f32[16,128], index: 2, kind: input, shape index: {}]   ;;  %s1081_s3 = inlined_call_operand.vmem [shape: f32[1,128], index: 3, kind: input, shape index: {}]   ;;  %s1082_s4 = inlined_call_operand.vmem [shape: f32[16,128], index: 4, kind: output, shape index: {0}]   ;;  %s1083_s5 = inlined_call_operand.hbm [shape: f32[1], index: 5, kind: output, shape index: {1}]   ;;  %s1084_s6 = inlined_call_operand.hbm [shape: s32[1], index: 6, kind: output, shape index: {2}]  }
   0x1   :  { %14 = vsyncpa [#allocation8], 0  ;;  %v715_v0 = vld [vmem:[%s1081_s3] ss:$0 sm:$0xff]  ;;  %v904_v1 = vmov 0.0   ;;  %s951_s27 = smov 1.0  }
   0x2   :  { %30 = vst [vmem:[%s1082_s4] sm:$0xff] %v715_v0  ;;  %31 = vst [vmem:[%s1082_s4 + $0x8] sm:$0xff] %v715_v0  ;;  %s953_s28 = smov 1.0   ;;  %s955_s29 = smov 10  }
   0x3   :  { %32 = vst [vmem:[#allocation2] sm:$0xff] %v904_v1  ;;  %33 = vst [vmem:[#allocation2 + $0x8] sm:$0xff] %v904_v1  ;;  %s957_s3 = smov 100000.0   ;;  %s959_s30 = smov 0  }
   0x4   :  { %34 = vst [vmem:[#allocation3 + $0x8] sm:$0xff] %v904_v1  ;;  %35 = vst [vmem:[#allocation3] sm:$0xff] %v904_v1 }
   0x5 LB: > { %v59_v4 = vld [vmem:[%s1079_s1] sm:$0xff]  ;;  %vm61_vm0 = vcmask 130048   ;;  %v60_v7 = vld [vmem:[%s1079_s1 + $0x8] sm:$0xff]  ;;  %s1011_s30 = sadd.s32 1, %s902_s30   ;;  %s589_s20 = smul.f32 0.9, %s890_s28   ;;  %s902_s30 = sphi %s959_s30, %s1091_s30   ;;  %s898_s3 = sphi %s957_s3, %s1090_s3   ;;  %s894_s29 = sphi %s955_s29, %s1089_s29   ;;  %s890_s28 = sphi %s953_s28, %s1088_s28   ;;  %s886_s27 = sphi %s951_s27, %s1087_s27  }
   0x6   : > { %v63_v8 = vsel %vm61_vm0, %v59_v4, 0  ;;  %v66_v9 = vsel %vm61_vm0, %v60_v7, 0  ;;  %v58_v45 = vld [vmem:[%s1080_s2 + $0x8] sm:$0xff]  ;;  %v57_v51 = vld [vmem:[%s1080_s2] sm:$0xff]  ;;  %s1085_s19 = smov %s1011_s30  ;;  %s590_s21 = smul.f32 0.999, %s886_s27  }
   0x7   : > { %v135_v10 = vand.u32 4294901760, %v63_v8  ;;  %v145_v12 = vand.u32 4294901760, %v66_v9  ;;  %s591_s22 = ssub.f32 1.0, %s589_s20  ;;  %s716_s11 = sadd.s32 4294967295, %s894_s29 }
   0x8   : > { %s596_s23 = ssub.f32 1.0, %s590_s21  ;;  %p44_p1 = scmp.lt.s32.totalorder %s1085_s19, 10 }
   0x9   : > { %v979_v2 = vld [vmem:[%s1082_s4 + $0x8] sm:$0xff]  ;;  %v984_v3 = vld [vmem:[%s1082_s4] sm:$0xff]  ;;  %v136_v14 = vsub.f32 %v63_v8, %v135_v10  ;;  %752 = vmatprep.mubr.f32.mxu1 %v135_v10  ;;  %v146_v16 = vsub.f32 %v66_v9, %v145_v12  ;;  %s1087_s27 = smov %s590_s21  ;;  %s1088_s28 = smov %s589_s20 }
   0xa   : > { %v97_v5 = vand.u32 4294901760, %v979_v2  ;;  %v100_v6 = vand.u32 4294901760, %v984_v3  ;;  %v601_v47 = vld [vmem:[#allocation2 + $0x8] sm:$0xff]  ;;  %v600_v50 = vld [vmem:[#allocation2] sm:$0xff] }
   0xb   : > { %v137_v18 = vand.u32 4294901760, %v136_v14  ;;  %v147_v20 = vand.u32 4294901760, %v146_v16  ;;  %v603_v56 = vmul.f32 0.9, %v601_v47  ;;  %v608_v57 = vld [vmem:[#allocation3 + $0x8] sm:$0xff]  ;;  %v609_v58 = vld [vmem:[#allocation3] sm:$0xff] }
   0xc   : > { %741 = vmatprep.subr.mxu0 %v97_v5  ;;  %v185_v11 = vsub.f32 %v979_v2, %v97_v5  ;;  %v192_v13 = vsub.f32 %v984_v3, %v100_v6  ;;  %v602_v59 = vmul.f32 0.9, %v600_v50  ;;  %v610_v1 = vmul.f32 0.999, %v608_v57 }
   0xd   : > { %742 = vmatpush3.msra.mxu0 %v97_v5  ;;  %v138_v22 = vsub.f32 %v136_v14, %v137_v18  ;;  %v148_v24 = vsub.f32 %v146_v16, %v147_v20  ;;  %v611_v4 = vmul.f32 0.999, %v609_v58 }
   0xe   : > { %743 = vmatprep.subr.mxu0 %v100_v6  ;;  %v186_v15 = vand.u32 4294901760, %v185_v11  ;;  %v193_v17 = vand.u32 4294901760, %v192_v13 }
   0xf   : > { %744 = vmatpush3.msra.mxu0 %v100_v6  ;;  %v139_v26 = vand.u32 4294901760, %v138_v22  ;;  %v149_v27 = vand.u32 4294901760, %v148_v24 }
  0x10   : > { %v187_v19 = vsub.f32 %v185_v11, %v186_v15  ;;  %v194_v21 = vsub.f32 %v192_v13, %v193_v17  ;;  %755 = vmatprep.subr.mxu0 %v185_v11 }
  0x11   : > { %745 = vmatprep.mubr.f32.mxu0 %v139_v26 }
  0x12   : > { %v188_v23 = vand.u32 4294901760, %v187_v19  ;;  %v195_v25 = vand.u32 4294901760, %v194_v21  ;;  %746 = vmatmul.mubr.f32.vlgmr.msra.gmra.mxu0 %v149_v27 }
  0x13   : > { %756 = vmatpush3.msra.mxu0 %v185_v11  ;;  %759 = vmatprep.mubr.f32.mxu0 %v136_v14 }
  0x14   : > { %748 = vmatprep.subr.mxu1 %v188_v23  ;;  %757 = vmatprep.subr.mxu0 %v192_v13 }
  0x15   : > { %749 = vmatpush3.msra.mxu1 %v188_v23  ;;  %758 = vmatpush3.msra.mxu0 %v192_v13 }
  0x16   : > { %750 = vmatprep.subr.mxu1 %v195_v25  ;;  %760 = vmatmul.mubr.f32.vlgmr.msra.gmra.mxu0 %v146_v16 }
  0x17   : > { %751 = vmatpush3.msra.mxu1 %v195_v25  ;;  %769 = vmatprep.subr.mxu0 %v186_v15 }
  0x18   : > { %753 = vmatmul.mubr.f32.vlgmr.msra.gmra.mxu1 %v145_v12  ;;  %762 = vmatprep.subr.mxu1 %v97_v5 }
  0x19   : > { %763 = vmatpush3.msra.mxu1 %v97_v5  ;;  %766 = vmatprep.mubr.f32.mxu1 %v137_v18  ;;  %v597_v18 = vstv %s596_s23 }
  0x1a   : > { %764 = vmatprep.subr.mxu1 %v100_v6  ;;  %770 = vmatpush3.msra.mxu0 %v186_v15 }
  0x1b   : > { %765 = vmatpush3.msra.mxu1 %v100_v6  ;;  %771 = vmatprep.subr.mxu0 %v193_v17 }
  0x1c   : > { %767 = vmatmul.mubr.f32.vlgmr.msra.gmra.mxu1 %v147_v20  ;;  %776 = vmatprep.subr.mxu1 %v97_v5 }
  0x1d   : > { %772 = vmatpush3.msra.mxu0 %v193_v17  ;;  %773 = vmatprep.mubr.f32.mxu0 %v135_v10  ;;  %v592_v17 = vstv %s591_s22 }
  0x1e   : > { %777 = vmatpush3.msra.mxu1 %v97_v5  ;;  %774 = vmatmul.mubr.f32.vlgmr.msra.gmra.mxu0 %v145_v12  ;;  %832 = vrcp.f32 %v592_v17 }
  0x1f   : > { %778 = vmatprep.subr.mxu1 %v100_v6  ;;  %780 = vmatprep.mubr.f32.mxu1 %v135_v10  ;;  %834 = vrcp.f32 %v597_v18 }
  0x20   : > { %779 = vmatpush3.msra.mxu1 %v100_v6 }
  0x21   : > { %781 = vmatmul.mubr.f32.vlgmr.msra.gmra.mxu1 %v145_v12 }
  0x2b   : > { %v833_v25 = vpop.eup %832 }
  0x2c   : > { %v835_v27 = vpop.eup %834 }
  0xd2   : > { %v747_v28 = vpop.f32.mrf.mxu0 }
  0xd4   : > { %v141_v29 = vpop.f32.mrf.mxu0 }
  0xd6   : > { %v761_v34 = vpop.f32.mrf.mxu0 }
  0xd8   : > { %v754_v30 = vpop.f32.mrf.mxu1  ;;  %v314_v36 = vpop.f32.mrf.mxu0 }
  0xd9   : > { %v239_v31 = vadd.f32 %v754_v30, %v747_v28 }
  0xda   : > { %v232_v32 = vpop.f32.mrf.mxu1 }
  0xdb   : > { %v233_v33 = vadd.f32 %v232_v32, %v141_v29  ;;  %v322_v35 = vadd.f32 %v761_v34, %v239_v31 }
  0xdc   : > { %v768_v38 = vpop.f32.mrf.mxu1 }
  0xdd   : > { %v315_v37 = vadd.f32 %v314_v36, %v233_v33  ;;  %v405_v39 = vadd.f32 %v768_v38, %v322_v35 }
  0xde   : > { %v396_v40 = vpop.f32.mrf.mxu1  ;;  %v775_v42 = vpop.f32.mrf.mxu0 }
  0xdf   : > { %v397_v41 = vadd.f32 %v396_v40, %v315_v37  ;;  %v488_v43 = vadd.f32 %v775_v42, %v405_v39 }
  0xe0   : > { %v481_v44 = vpop.f32.mrf.mxu0 }
  0xe1   : > { %v782_v46 = vpop.f32.mrf.mxu1  ;;  %v482_v48 = vadd.f32 %v481_v44, %v397_v41 }
  0xe2   : > { %v567_v49 = vadd.f32 %v782_v46, %v488_v43 }
  0xe3   : > { %v560_v52 = vpop.f32.mrf.mxu1 }
  0xe4   : > { %v571_v53 = vadd.f32 %v567_v49, %v58_v45  ;;  %v573_v54 = vmul.f32 0.5, %v567_v49  ;;  %v561_v55 = vadd.f32 %v560_v52, %v482_v48 }
  0xe6   : > { %v605_v60 = vmul.f32 0.1, %v571_v53  ;;  %v613_v61 = vmul.f32 %v571_v53, %v571_v53  ;;  %v570_v62 = vadd.f32 %v561_v55, %v57_v51  ;;  %v572_v63 = vmul.f32 0.5, %v561_v55 }
  0xe7   : > { %v575_v0 = vadd.f32 %v573_v54, %v58_v45 }
  0xe8   : > { %v604_v5 = vmul.f32 0.1, %v570_v62  ;;  %v612_v6 = vmul.f32 %v570_v62, %v570_v62  ;;  %v574_v7 = vadd.f32 %v572_v63, %v57_v51  ;;  %v1002_v8 = vadd.f32 %v605_v60, %v603_v56 }
  0xe9   : > { %v615_v9 = vmul.f32 0.001, %v613_v61  ;;  %v577_v11 = vmul.f32 %v575_v0, %v979_v2 }
  0xea   : > { %v576_v10 = vmul.f32 %v574_v7, %v984_v3  ;;  %v1006_v12 = vadd.f32 %v604_v5, %v602_v59  ;;  %649 = vst [vmem:[#allocation2 + $0x8] sm:$0xff] %v1002_v8  ;;  %v614_v13 = vmul.f32 0.001, %v612_v6 }
  0xeb   : > { %v617_v14 = vadd.f32 %v615_v9, %v611_v4 }
  0xec   : > { %v578_v15 = vadd.f32 %v577_v11, %v576_v10  ;;  %648 = vst [vmem:[#allocation2] sm:$0xff] %v1006_v12  ;;  %v616_v16 = vadd.f32 %v614_v13, %v610_v1 }
  0xed   : > { %651 = vst [vmem:[#allocation3] sm:$0xff] %v617_v14 }
  0xee   : > { %579 = vadd.xlane.f32.xlu0 %v578_v15  ;;  %650 = vst [vmem:[#allocation3 + $0x8] sm:$0xff] %v616_v16 }
 0x177   : > { %v580_v19 = vpop.xlane.xlu0 %579 }
 0x178   : > { %v581_v20 = vrot.slane %v580_v19, 4 }
 0x17a   : > { %v582_v21 = vadd.f32 %v581_v20, %v580_v19 }
 0x17c   : > { %v583_v22 = vrot.slane %v582_v21, 2 }
 0x17e   : > { %v584_v23 = vadd.f32 %v583_v22, %v582_v21 }
 0x180   : > { %v585_v24 = vrot.slane %v584_v23, 1 }
 0x182   : > { %v586_v26 = vadd.f32 %v585_v24, %v584_v23 }
 0x184   : > { %783 = vpush %v586_v26 }
 0x185   : > { %785 = vpush %v833_v25 }
 0x186   : > { %787 = vpush %v835_v27 }
 0x1b5   : > { %s784_s24 = spop %783 }
 0x1b6   : > { %s1022_s30 = sadd.f32 %s784_s24, %s1078_s0   ;;  %s1024_s8 = spop %785 }
 0x1b7   : > { %s788_s9 = spop %787 }
 0x1b8   : > { %s1086_s7 = smov %s1022_s30  ;;  %v618_v28 = vstv %s788_s9  ;;  %s1091_s30 = smov %s1085_s19 }
 0x1b9   : > { %s1028_s10 = ssub.f32 %s898_s3, %s1086_s7  ;;  %v619_v29 = vmul.f32 %v618_v28, %v616_v16  ;;  %v620_v30 = vmul.f32 %v618_v28, %v617_v14  ;;  %s1090_s3 = smov %s1086_s7 }
 0x1bb   : > { %p653_p0 = scmp.lt.f32.partialorder %s1028_s10, 0.0  ;;  %836 = vrsqrt.f32 %v619_v29  ;;  %vm623_vm1 = vcmp.eq.f32.partialorder %v619_v29, inf  ;;  %v626_v34 = vand.u32 2147483648, %v619_v29  ;;  %vm625_vm2 = vcmp.eq.f32.partialorder %v619_v29, 0.0  ;;  %p45_p2 = scmp.ge.f32.partialorder %s1028_s10, 1e-05 }
 0x1bc   : > { %838 = vrsqrt.f32 %v620_v30  ;;  %vm630_vm3 = vcmp.eq.f32.partialorder %v620_v30, inf  ;;  %v633_v37 = vand.u32 2147483648, %v620_v30  ;;  %vm632_vm4 = vcmp.eq.f32.partialorder %v620_v30, 0.0 }
 0x1bd   : > { %s1093_s11 = smov (!%p653_p0, %s716_s11), %s894_s29  ;;  %s595_s29 = smul.f32 0.01, %s1024_s8 }
 0x1be   : > { %p47_p3 = scmp.gt.s32.totalorder %s1093_s11, 0 }
 0x1bf   : > { %v637_v43 = vstv %s595_s29  ;;  %s1089_s29 = smov %s1093_s11 }
 0x1c0   : > { %v638_v44 = vmul.f32 %v637_v43, %v1006_v12  ;;  %v639_v46 = vmul.f32 %v637_v43, %v1002_v8  ;;  %p48_p4 = pnand %p653_p0, %p47_p3 }
 0x1c2   : > { %p49_p5 = pneg %p48_p4 }
 0x1c4   : > { %p50_p6 = por %p49_p5, %p45_p2 }
 0x1c6   : > { %p51_p7 = pnand %p50_p6, %p44_p1 }
 0x1c7   :  { %658 = sst [smem:[#allocation5]] (%p51_p7), %s1086_s7  ;;  %s905_s15 = smov (%p51_p7), [#allocation5]  }
 0x1c8   : > { %v837_v31 = vpop.eup %836  ;;  %670 = dma.smem_to_hbm (%p51_p7), %s905_s15, 16, %s1083_s5, [#allocation6]  }
 0x1c9   : > { %v839_v32 = vpop.eup %838  ;;  %v622_v33 = vmul.f32 %v837_v31, %v619_v29  ;;  %660 = sst [smem:[#allocation7]] (%p51_p7), %s1085_s19  ;;  %s906_s18 = smov (%p51_p7), [#allocation7]  }
 0x1ca   : > { %v629_v35 = vmul.f32 %v839_v32, %v620_v30  ;;  %678 = dma.smem_to_hbm (%p51_p7), %s906_s18, 16, %s1084_s6, [#allocation8]  }
 0x1cb   : > { %v624_v36 = vsel %vm623_vm1, %v619_v29, %v622_v33 }
 0x1cc   : > { %v627_v38 = vsel %vm625_vm2, %v626_v34, %v624_v36  ;;  %v631_v39 = vsel %vm630_vm3, %v620_v30, %v629_v35 }
 0x1cd   : > { %v634_v40 = vsel %vm632_vm4, %v633_v37, %v631_v39  ;;  %v635_v41 = vadd.f32 1e-08, %v627_v38 }
 0x1ce   : > { %v636_v42 = vadd.f32 1e-08, %v634_v40 }
 0x1cf   : > { %840 = vrcp.f32 %v635_v41 }
 0x1d0   : > { %842 = vrcp.f32 %v636_v42 }
 0x1dc   : > { %v841_v45 = vpop.eup %840 }
 0x1dd   : > { %v843_v47 = vpop.eup %842  ;;  %v641_v48 = vmul.f32 %v841_v45, %v638_v44 }
 0x1de   : > { %v643_v49 = vmul.f32 %v843_v47, %v639_v46  ;;  %54 = sbr.rel (!%p51_p7) target bundleno = 5 (0x5), region = 61 }
 0x1df   : > { %v644_v50 = vsub.f32 %v984_v3, %v641_v48 }
 0x1e0   : > { %v645_v51 = vsub.f32 %v979_v2, %v643_v49 }
 0x1e1   : > { %646 = vst [vmem:[%s1082_s4] sm:$0xff] %v644_v50 }
 0x1e2   : > { %647 = vst [vmem:[%s1082_s4 + $0x8] sm:$0xff] %v645_v51 }
 0x1e3   :  { %880 = dma.done.wait [#allocation6], 16  }
 0x1e4   :  { %881 = vsyncadd [#allocation6], 4294967280 }
 0x1e5   :  { %882 = dma.done.wait [#allocation8], 16  }
 0x1e6   :  { %883 = vsyncadd [#allocation8], 4294967280 }
 0x1e7   :  { %687 = sfence }
 0x1e8   :  { %688 = vsyncpa [#allocation6], 1 }
 0x1e9   :  { %689 = vsyncpa [#allocation8], 1 }

</bundles_post_ra>
